<compile_context>
chip_gen: v5e
topology: v5e:2x2
jax: 0.10.0
libtpu: 0.0.40
codegen_flags: <defaults>
</compile_context>

<pallas_src>
import functools

import jax
import jax.numpy as jnp
from jax import lax
from jax.experimental import pallas as pl
from jax.experimental.pallas import tpu as pltpu

ACT_PAD = 8  # Q-value rows padded to one sublane group (num_actions=2 -> 8).


def _round_up(n: int, m: int) -> int:
    return ((n + m - 1) // m) * m


def dqn_kernel(x_ref, w1_ref, b1_ref, w2_ref, b2_ref, w3t_ref, b3t_ref, qt_ref):
    """Fused 3-layer MLP on one (TB, in) batch tile.

    Q-values are produced transposed: (ACT_PAD, TB) f32, batch on lanes, so the
    output store is lane-dense and 16x smaller than a 128-padded layout.
    """
    x = x_ref[...].astype(jnp.bfloat16)                                     # (TB, IN)
    h1 = jnp.dot(x, w1_ref[...], preferred_element_type=jnp.float32) + b1_ref[...]
    h1 = jnp.maximum(h1, 0.0).astype(jnp.bfloat16)                          # (TB, H)
    h2 = jnp.dot(h1, w2_ref[...], preferred_element_type=jnp.float32) + b2_ref[...]
    h2 = jnp.maximum(h2, 0.0).astype(jnp.bfloat16)                          # (TB, H)
    # (ACT_PAD, H) x (TB, H) contracting H -> (ACT_PAD, TB): MXU emits the
    # transposed result directly (same NT pattern as q @ k.T in flash attn).
    qt = lax.dot_general(
        w3t_ref[...], h2,
        dimension_numbers=(((1,), (1,)), ((), ())),
        preferred_element_type=jnp.float32,
    )
    qt_ref[...] = qt + b3t_ref[...]                                         # (ACT_PAD, TB)


def prepare_params(params):
    """One-time cast/pad of DQN parameters (hoisted out of the per-call path).

    w3/b3 are stored transposed with actions zero-padded to ACT_PAD rows.
    """
    w1, b1 = params["w1"], params["b1"]
    w2, b2 = params["w2"], params["b2"]
    w3, b3 = params["w3"], params["b3"]
    hidden = w1.shape[1]
    num_actions = w3.shape[1]
    w3t = jnp.zeros((ACT_PAD, hidden), jnp.bfloat16).at[:num_actions, :].set(
        w3.T.astype(jnp.bfloat16))
    b3t = jnp.zeros((ACT_PAD, 1), jnp.float32).at[:num_actions, 0].set(
        b3.reshape(-1).astype(jnp.float32))
    return {
        "w1": w1.astype(jnp.bfloat16),                     # (in, hidden)
        "b1": b1.reshape(1, hidden).astype(jnp.float32),   # (1, hidden)
        "w2": w2.astype(jnp.bfloat16),                     # (hidden, hidden)
        "b2": b2.reshape(1, hidden).astype(jnp.float32),   # (1, hidden)
        "w3t": w3t,                                        # (ACT_PAD, hidden)
        "b3t": b3t,                                        # (ACT_PAD, 1)
    }


def _choose_tile(B: int, tb_max: int):
    """Batch-tile heuristic: single block for small B; otherwise a multiple of
    128 (lane-dense transposed output) chosen so the grid has >=2 steps, which
    lets dimension_semantics=('parallel',) use both v7x TensorCores."""
    if B < 256:
        tb = _round_up(max(B, 8), 8)
    else:
        tb = min(tb_max, _round_up(pl.cdiv(B, 2), 128))
    n_blocks = pl.cdiv(B, tb)
    return tb, n_blocks


@functools.partial(jax.jit, static_argnames=("num_actions", "tb_max"))
def dqn_forward(x, prepped, num_actions: int = 2, tb_max: int = 1024):
    """x: (B, input_size) f32; prepped: output of prepare_params.

    Returns (B, num_actions) f32 — same semantics as the PyTorch DQN forward
    (bf16 matmul inputs, f32 accumulation / bias / ReLU).
    """
    w1, b1 = prepped["w1"], prepped["b1"]
    w2, b2 = prepped["w2"], prepped["b2"]
    w3t, b3t = prepped["w3t"], prepped["b3t"]
    B, in_f = x.shape
    hidden = w1.shape[1]

    tb, n_blocks = _choose_tile(B, tb_max)
    b_out = n_blocks * tb

    # Weights/biases: single full-extent block with constant index -> stay
    # VMEM-resident across all grid steps (~20 KB total, no re-DMA).
    resident = lambda a: pl.BlockSpec(a.shape, lambda i: (0,) * a.ndim)

    flops = 2 * B * (in_f * hidden + hidden * hidden + hidden * ACT_PAD)
    bytes_accessed = (
        x.size * x.dtype.itemsize
        + sum(int(a.size) * a.dtype.itemsize for a in (w1, b1, w2, b2, w3t, b3t))
        + ACT_PAD * b_out * 4
    )

    qt = pl.pallas_call(
        dqn_kernel,
        out_shape=jax.ShapeDtypeStruct((ACT_PAD, b_out), jnp.float32),
        grid=(n_blocks,),
        in_specs=[
            pl.BlockSpec((tb, in_f), lambda i: (i, 0)),    # x: batch-tiled, unpadded
            resident(w1), resident(b1),
            resident(w2), resident(b2),
            resident(w3t), resident(b3t),
        ],
        out_specs=pl.BlockSpec((ACT_PAD, tb), lambda i: (0, i)),
        compiler_params=pltpu.CompilerParams(
            dimension_semantics=("parallel",),             # shard batch tiles across TCs
        ),
        cost_estimate=pl.CostEstimate(
            flops=flops, transcendentals=0, bytes_accessed=bytes_accessed),
    )(x, w1, b1, w2, b2, w3t, b3t)

    # Compact slice + transpose back to the PyTorch (B, num_actions) layout.
    # Padded action rows are exact zeros; padded batch lanes are garbage and
    # are dropped here — never reduce over the padded slab directly.
    return qt[:num_actions, :B].T


def init_params(key, input_size=4, hidden_size=64, num_actions=2):
    """Deterministic init matching torch.nn.Linear (U(-1/sqrt(fan_in), +1/sqrt(fan_in)))."""
    ks = jax.random.split(key, 6)

    def linear(kw, kb, fan_in, fan_out):
        bound = 1.0 / jnp.sqrt(jnp.float32(fan_in))
        w = jax.random.uniform(kw, (fan_in, fan_out), jnp.float32, -bound, bound)
        b = jax.random.uniform(kb, (1, fan_out), jnp.float32, -bound, bound)
        return w, b

    w1, b1 = linear(ks[0], ks[1], input_size, hidden_size)
    w2, b2 = linear(ks[2], ks[3], hidden_size, hidden_size)
    w3, b3 = linear(ks[4], ks[5], hidden_size, num_actions)
    return {"w1": w1, "b1": b1, "w2": w2, "b2": b2, "w3": w3, "b3": b3}


def dqn_reference_f32(x, p):
    h1 = jnp.maximum(x @ p["w1"] + p["b1"], 0.0)
    h2 = jnp.maximum(h1 @ p["w2"] + p["b2"], 0.0)
    return h2 @ p["w3"] + p["b3"]


def dqn_reference_bf16(x, p):
    # Mirrors the kernel's precision: bf16 matmul inputs, f32 accumulate / bias / ReLU.
    bf = jnp.bfloat16
    h1 = jnp.dot(x.astype(bf), p["w1"].astype(bf), preferred_element_type=jnp.float32) + p["b1"]
    h1 = jnp.maximum(h1, 0.0).astype(bf)
    h2 = jnp.dot(h1, p["w2"].astype(bf), preferred_element_type=jnp.float32) + p["b2"]
    h2 = jnp.maximum(h2, 0.0).astype(bf)
    return jnp.dot(h2, p["w3"].astype(bf), preferred_element_type=jnp.float32) + p["b3"]


if __name__ == "__main__":
    key = jax.random.PRNGKey(0)
    kx, kp, kx2 = jax.random.split(key, 3)
    input_size, hidden_size, num_actions = 4, 64, 2

    params = init_params(kp, input_size, hidden_size, num_actions)
    prepped = prepare_params(params)   # one-time pad/cast, reused across calls

    # Small batch (single-block path).
    x = jax.random.normal(kx, (8, input_size), jnp.float32)
    out = jax.block_until_ready(dqn_forward(x, prepped, num_actions=num_actions))
    assert out.shape == (8, num_actions)
    assert jnp.allclose(out, dqn_reference_bf16(x, params), atol=2e-3, rtol=2e-3), \
        "mismatch vs bf16 reference (small batch)"
    assert jnp.allclose(out, dqn_reference_f32(x, params), atol=5e-2, rtol=5e-2), \
        "mismatch vs f32 reference (small batch)"

    # Larger batch: multi-block grid with a ragged last block.
    x2 = jax.random.normal(kx2, (384, input_size), jnp.float32)
    out2 = jax.block_until_ready(dqn_forward(x2, prepped, num_actions=num_actions))
    assert out2.shape == (384, num_actions)
    assert jnp.allclose(out2, dqn_reference_bf16(x2, params), atol=2e-3, rtol=2e-3), \
        "mismatch vs bf16 reference (large batch)"

    print("KERNEL_OK")
</pallas_src>

<mosaic_0001>
module attributes {stable_mosaic.version = 11 : i64} {
  func.func @dqn_kernel(%arg0: i32, %arg1: memref<8x4xf32, #tpu.memory_space<vmem>>, %arg2: memref<4x64xbf16, #tpu.memory_space<vmem>>, %arg3: memref<1x64xf32, #tpu.memory_space<vmem>>, %arg4: memref<64x64xbf16, #tpu.memory_space<vmem>>, %arg5: memref<1x64xf32, #tpu.memory_space<vmem>>, %arg6: memref<8x64xbf16, #tpu.memory_space<vmem>>, %arg7: memref<8x1xf32, #tpu.memory_space<vmem>>, %arg8: memref<8x8xf32, #tpu.memory_space<vmem>>) attributes {dimension_semantics = [#tpu.dimension_semantics<parallel>], iteration_bounds = array<i64: 1>, scalar_prefetch = 0 : i64, scratch_operands = 0 : i64, tpu.core_type = #tpu.core_type<tc>, window_params = [{transform_indices = @transform_0, window_bounds = array<i64: 8, 4>}, {pipeline_mode = #tpu.pipeline_mode<synchronous>, transform_indices = @transform_1, window_bounds = array<i64: 4, 64>}, {pipeline_mode = #tpu.pipeline_mode<synchronous>, transform_indices = @transform_2, window_bounds = array<i64: 1, 64>}, {pipeline_mode = #tpu.pipeline_mode<synchronous>, transform_indices = @transform_3, window_bounds = array<i64: 64, 64>}, {pipeline_mode = #tpu.pipeline_mode<synchronous>, transform_indices = @transform_4, window_bounds = array<i64: 1, 64>}, {pipeline_mode = #tpu.pipeline_mode<synchronous>, transform_indices = @transform_5, window_bounds = array<i64: 8, 64>}, {pipeline_mode = #tpu.pipeline_mode<synchronous>, transform_indices = @transform_6, window_bounds = array<i64: 8, 1>}, {transform_indices = @transform_7, window_bounds = array<i64: 8, 8>}]} {
    %c0 = arith.constant 0 : index
    %c0_0 = arith.constant 0 : index
    %0 = vector.load %arg1[%c0, %c0_0] : memref<8x4xf32, #tpu.memory_space<vmem>>, vector<8x4xf32>
    %1 = arith.truncf %0 : vector<8x4xf32> to vector<8x4xbf16>
    %c0_1 = arith.constant 0 : index
    %c0_2 = arith.constant 0 : index
    %2 = vector.load %arg2[%c0_1, %c0_2] : memref<4x64xbf16, #tpu.memory_space<vmem>>, vector<4x64xbf16>
    %cst = arith.constant dense<0.000000e+00> : vector<8x64xf32>
    %3 = tpu.matmul %1, %2, %cst {dimension_numbers = #tpu.dot_dimension_numbers<[1], [0], [0], [1], [0, 0, 1, 1], [], []>} : vector<8x4xbf16>, vector<4x64xbf16>, vector<8x64xf32> -> vector<8x64xf32>
    %c0_3 = arith.constant 0 : index
    %c0_4 = arith.constant 0 : index
    %4 = vector.load %arg3[%c0_3, %c0_4] : memref<1x64xf32, #tpu.memory_space<vmem>>, vector<1x64xf32>
    %5 = vector.broadcast %4 : vector<1x64xf32> to vector<8x64xf32>
    %6 = arith.addf %3, %5 : vector<8x64xf32>
    %cst_5 = arith.constant 0.000000e+00 : f32
    %7 = vector.broadcast %cst_5 : f32 to vector<8x64xf32>
    %8 = arith.maximumf %6, %7 : vector<8x64xf32>
    %9 = arith.truncf %8 : vector<8x64xf32> to vector<8x64xbf16>
    %c0_6 = arith.constant 0 : index
    %c0_7 = arith.constant 0 : index
    %10 = vector.load %arg4[%c0_6, %c0_7] : memref<64x64xbf16, #tpu.memory_space<vmem>>, vector<64x64xbf16>
    %cst_8 = arith.constant dense<0.000000e+00> : vector<8x64xf32>
    %11 = tpu.matmul %9, %10, %cst_8 {dimension_numbers = #tpu.dot_dimension_numbers<[1], [0], [0], [1], [0, 0, 1, 1], [], []>} : vector<8x64xbf16>, vector<64x64xbf16>, vector<8x64xf32> -> vector<8x64xf32>
    %c0_9 = arith.constant 0 : index
    %c0_10 = arith.constant 0 : index
    %12 = vector.load %arg5[%c0_9, %c0_10] : memref<1x64xf32, #tpu.memory_space<vmem>>, vector<1x64xf32>
    %13 = vector.broadcast %12 : vector<1x64xf32> to vector<8x64xf32>
    %14 = arith.addf %11, %13 : vector<8x64xf32>
    %cst_11 = arith.constant 0.000000e+00 : f32
    %15 = vector.broadcast %cst_11 : f32 to vector<8x64xf32>
    %16 = arith.maximumf %14, %15 : vector<8x64xf32>
    %17 = arith.truncf %16 : vector<8x64xf32> to vector<8x64xbf16>
    %c0_12 = arith.constant 0 : index
    %c0_13 = arith.constant 0 : index
    %18 = vector.load %arg6[%c0_12, %c0_13] : memref<8x64xbf16, #tpu.memory_space<vmem>>, vector<8x64xbf16>
    %cst_14 = arith.constant dense<0.000000e+00> : vector<8x8xf32>
    %19 = tpu.matmul %18, %17, %cst_14 {dimension_numbers = #tpu.dot_dimension_numbers<[1], [1], [0], [0], [0, 0, 1, 0], [], []>} : vector<8x64xbf16>, vector<8x64xbf16>, vector<8x8xf32> -> vector<8x8xf32>
    %c0_15 = arith.constant 0 : index
    %c0_16 = arith.constant 0 : index
    %20 = vector.load %arg7[%c0_15, %c0_16] : memref<8x1xf32, #tpu.memory_space<vmem>>, vector<8x1xf32>
    %21 = vector.broadcast %20 : vector<8x1xf32> to vector<8x8xf32>
    %22 = arith.addf %19, %21 : vector<8x8xf32>
    %c0_17 = arith.constant 0 : index
    %c0_18 = arith.constant 0 : index
    %23 = vector.load %arg8[%c0_17, %c0_18] : memref<8x8xf32, #tpu.memory_space<vmem>>, vector<8x8xf32>
    tpu.vector_store %arg8[%c0_17, %c0_18], %22 {strides = array<i32>} : memref<8x8xf32, #tpu.memory_space<vmem>>, vector<8x8xf32>,
    return
  }
  func.func @transform_0(%arg0: i32) -> (i32, i32) {
    %c0_i32 = arith.constant 0 : i32
    %c0_i32_0 = arith.constant 0 : i32
    return %arg0, %c0_i32 : i32, i32
  }
  func.func @transform_1(%arg0: i32) -> (i32, i32) {
    %c0_i32 = arith.constant 0 : i32
    %c0_i32_0 = arith.constant 0 : i32
    %c0_i32_1 = arith.constant 0 : i32
    return %c0_i32, %c0_i32_0 : i32, i32
  }
  func.func @transform_2(%arg0: i32) -> (i32, i32) {
    %c0_i32 = arith.constant 0 : i32
    %c0_i32_0 = arith.constant 0 : i32
    %c0_i32_1 = arith.constant 0 : i32
    return %c0_i32, %c0_i32_0 : i32, i32
  }
  func.func @transform_3(%arg0: i32) -> (i32, i32) {
    %c0_i32 = arith.constant 0 : i32
    %c0_i32_0 = arith.constant 0 : i32
    %c0_i32_1 = arith.constant 0 : i32
    return %c0_i32, %c0_i32_0 : i32, i32
  }
  func.func @transform_4(%arg0: i32) -> (i32, i32) {
    %c0_i32 = arith.constant 0 : i32
    %c0_i32_0 = arith.constant 0 : i32
    %c0_i32_1 = arith.constant 0 : i32
    return %c0_i32, %c0_i32_0 : i32, i32
  }
  func.func @transform_5(%arg0: i32) -> (i32, i32) {
    %c0_i32 = arith.constant 0 : i32
    %c0_i32_0 = arith.constant 0 : i32
    %c0_i32_1 = arith.constant 0 : i32
    return %c0_i32, %c0_i32_0 : i32, i32
  }
  func.func @transform_6(%arg0: i32) -> (i32, i32) {
    %c0_i32 = arith.constant 0 : i32
    %c0_i32_0 = arith.constant 0 : i32
    %c0_i32_1 = arith.constant 0 : i32
    return %c0_i32, %c0_i32_0 : i32, i32
  }
  func.func @transform_7(%arg0: i32) -> (i32, i32) {
    %c0_i32 = arith.constant 0 : i32
    %c0_i32_0 = arith.constant 0 : i32
    return %c0_i32, %arg0 : i32, i32
  }
}

</mosaic_0001>

<bundles_post_ra>
// kernel: dqn_forward.1
= control target key start
LH: loop header
LB: loop body
LE: loop exit
PB: predicated region body
PF: predicated region fallthrough
CT: control target
= control target key end

     0   :  { %12 = vsyncpa [#allocation3], 0  ;;  %s217_s27 = smov [#allocation2]   ;;  %s218_s29 = smov 64   ;;  %s288_s0 = inlined_call_operand.vmem [shape: f32[8,4], index: 0, kind: input, shape index: {}]   ;;  %s289_s1 = inlined_call_operand.vmem [shape: bf16[4,64], index: 1, kind: input, shape index: {}]   ;;  %s290_s2 = inlined_call_operand.vmem [shape: f32[1,64], index: 2, kind: input, shape index: {}]   ;;  %s291_s3 = inlined_call_operand.hbm [shape: bf16[64,64], index: 3, kind: input, shape index: {}]   ;;  %s292_s4 = inlined_call_operand.vmem [shape: f32[1,64], index: 4, kind: input, shape index: {}]   ;;  %s293_s5 = inlined_call_operand.vmem [shape: bf16[8,64], index: 5, kind: input, shape index: {}]   ;;  %s294_s6 = inlined_call_operand.vmem [shape: f32[8,1], index: 6, kind: input, shape index: {}]   ;;  %s295_s7 = inlined_call_operand.vmem [shape: f32[8,8], index: 7, kind: output, shape index: {}]  }
   0x1   :  { %s23_s26 = sshll.u32 %s291_s3, 4  ;;  %s25_s28 = sshll.u32 %s217_s27, 4  ;;  %s24_s26 = int_to_ptr.hbm [resolvable:$true] %s23_s26  ;;  %s26_s28 = int_to_ptr.vmem [resolvable:$true] %s25_s28 }
   0x2   :  { %s219_s30 = smov 4  }
   0x3   :  { %31 = dma.hbm_to_vmem [thread:$0]  %s24_s26, 512, %s26_s28, [#allocation3], %s218_s29, %s218_s29, %s219_s30  }
   0x4   :  { %215 = dma.done.wait [#allocation3], 512  }
   0x5   :  { %216 = vsyncadd [#allocation3], 4294966784  ;;  %vm54_vm0 = vcmask 1041408   ;;  %v45_v0 = vld [vmem:[%s289_s1] sm:$0x3]  ;;  %v183_v2 = vld [vmem:[#allocation2 + $0x18] sm:$0xff] }
   0x6   :  { %v43_v1 = vld [vmem:[%s288_s0] sm:$0xff]  ;;  %v56_v3 = vsel %vm54_vm0, %v45_v0, 0  ;;  %vm50_vm1 = vcmask 31744   ;;  %117 = vmatpush.bf16.msra.mxu1 %v183_v2  ;;  %v182_v5 = vld [vmem:[#allocation2 + $0x10] sm:$0xff]  ;;  %v181_v6 = vld [vmem:[#allocation2 + $0x8] sm:$0xff]  ;;  %vm109_vm2 = vcmask 523264  }
   0x7   :  { %v44_v4 = vpack.c.bf16 %v43_v1, %v43_v1  ;;  %65 = vmatpush.bf16.msra.mxu0 %v56_v3  ;;  %v180_v7 = vld [vmem:[#allocation2] sm:$0xff]  ;;  %v220_v15 = vmov 0   ;;  %vm154_vm3 = vcmask 64512  }
   0x8   :  { %v189_v8 = vld [vmem:[%s290_s2] ss:$0 sm:$0xff]  ;;  %188 = vset.pattern.permute.xlu0 %v220_v15 }
   0x9   :  { %v129_v14 = vld [vmem:[%s294_s6] sm:$0xff] }
   0xa   :  { %161 = vmatmul.msk.bf16.vlgmr.msra.gmra.mxu0 %vm50_vm1, %v44_v4  ;;  %118 = vmatpush.bf16.msra.mxu1 %v182_v5  ;;  %v190_v16 = vld [vmem:[%s292_s4] ss:$0 sm:$0xff] }
   0xb   :  { %132 = vperm.xlu0 %188, %v129_v14   ;;  %v128_v23 = vld [vmem:[%s293_s5] sm:$0xf] }
   0xe   :  { %119 = vmatpush.bf16.msra.mxu1 %v181_v6 }
  0x12   :  { %120 = vmatpush.bf16.msra.mxu1 %v180_v7 }
  0x7d   :  { %v133_v24 = vpop.permute.xlu0 %132 }
  0x87   :  { %v67_v9 = vpop.f32.mrf.mxu0 }
  0x88   :  { %v68_v10 = vadd.f32 %v189_v8, %v67_v9 }
  0x8a   :  { %v71_v11 = vmax.f32 %v68_v10, 0.0 }
  0x8c   :  { %v72_v12 = vpack.c.bf16 %v71_v11, %v71_v11 }
  0x8e   :  { %178 = vmatmul.msk.bf16.vlgmr.msra.gmra.mxu1 %vm109_vm2, %v72_v12 }
  0x8f   :  { %v69_v13 = vpop.f32.mrf.mxu0 }
 0x10b   :  { %v122_v17 = vpop.f32.mrf.mxu1 }
 0x10c   :  { %v123_v18 = vadd.f32 %v190_v16, %v122_v17 }
 0x10e   :  { %v126_v19 = vmax.f32 %v123_v18, 0.0 }
 0x110   :  { %v127_v20 = vpack.c.bf16 %v126_v19, %v126_v19 }
 0x112   :  { %v139_v21 = vsel %vm109_vm2, %v127_v20, 0 }
 0x113   :  { %v124_v22 = vpop.f32.mrf.mxu1  ;;  %148 = vmatpush.bf16.xpose.msra.mxu2 %v139_v21 }
 0x11a   :  { %179 = vmatmul.msk.bf16.vlgmr.msra.gmra.mxu2 %vm109_vm2, %v128_v23 }
 0x19d   :  { %v150_v25 = vpop.f32.mrf.mxu2 }
 0x19e   :  { %v151_v26 = vadd.f32 %v150_v25, %v133_v24 }
 0x1a0   :  { %155 = vst.msk [vmem:[%s295_s7] sm:$0xff] %vm154_vm3, %v151_v26 }
 0x1a5   :  { %v152_v27 = vpop.f32.mrf.mxu2 }
 0x1a6   :  { %160 = vsyncpa [#allocation3], 1 }

</bundles_post_ra>
